<compile_context>
chip_gen: v7x
topology: tpu7x:2x2x1
jax: 0.10.0
libtpu: 0.0.40
codegen_flags: <defaults>
</compile_context>

<pallas_src>
import jax
import jax.numpy as jnp
from jax.experimental import pallas as pl
from jax.experimental.pallas import tpu as pltpu


def _maxpool_kernel(x_ref, o_ref):
    """Elementwise-max accumulation over the pooling-window grid axis.

    x_ref: (Ct, Lt) dense tile holding window element `s` (grid axis 3).
    o_ref: (Ct, Lt) output tile, VMEM-resident across the `s` axis.
    """
    s = pl.program_id(3)

    @pl.when(s == 0)
    def _init():
        o_ref[...] = x_ref[...]

    @pl.when(s != 0)
    def _update():
        o_ref[...] = jnp.maximum(o_ref[...], x_ref[...])


def _pick_tile(dim: int, quantum: int, target: int) -> int:
    """Tile size for `dim`: full dim if small, else the largest multiple of
    `quantum` <= `target`, preferring one that divides `dim` (no ragged edge)."""
    if dim <= target:
        return dim
    best = (target // quantum) * quantum
    for cand in range(best, quantum - 1, -quantum):
        if dim % cand == 0:
            return cand
    return best  # ragged last block; Pallas clamps edge DMAs


def frame_max_pool(visual_input: jax.Array, stride: int) -> jax.Array:
    """Pallas equivalent of FrameMaxPool.forward.

    visual_input: (N, C, L) array.  Returns (N, C, L // stride), same dtype.
    """
    if stride < 1:
        raise ValueError("stride must be >= 1")
    n, c, l = visual_input.shape
    l_out = l // stride
    if l_out == 0:
        raise ValueError("sequence length must be >= stride")

    itemsize = jnp.dtype(visual_input.dtype).itemsize
    sub_q = max(8, 32 // itemsize)   # sublane packing: 8 (f32) / 16 (bf16) / 32 (i8)
    lane_q = 128

    c_t = _pick_tile(c, sub_q, 256)
    l_t = _pick_tile(l_out, lane_q, 1024)

    # Layout glue (single, fusible XLA pass): drop remainder frames and move
    # the window axis off the minor dims -> (N, stride, C, L_out).
    x = visual_input[:, :, : l_out * stride]
    x = x.reshape(n, c, l_out, stride)      # free: splits the contiguous minor dim
    x = jnp.transpose(x, (0, 3, 1, 2))      # (N, stride, C, L_out)

    grid = (n, pl.cdiv(c, c_t), pl.cdiv(l_out, l_t), stride)

    cost = pl.CostEstimate(
        flops=n * c * l_out * max(stride - 1, 1),
        transcendentals=0,
        bytes_accessed=(n * c * (l_out * stride + l_out)) * itemsize,
    )

    out = pl.pallas_call(
        _maxpool_kernel,
        out_shape=jax.ShapeDtypeStruct((n, c, l_out), visual_input.dtype),
        grid=grid,
        in_specs=[
            pl.BlockSpec(
                (None, None, c_t, l_t),
                lambda b, ci, li, s: (b, s, ci, li),
            ),
        ],
        out_specs=pl.BlockSpec(
            (None, c_t, l_t),
            lambda b, ci, li, s: (b, ci, li),   # same block across s -> accumulator
        ),
        compiler_params=pltpu.CompilerParams(
            dimension_semantics=("parallel", "parallel", "parallel", "arbitrary"),
            vmem_limit_bytes=32 * 1024 * 1024,
            allow_input_fusion=[True],
        ),
        cost_estimate=cost,
    )(x)
    return out


if __name__ == "__main__":
    key = jax.random.PRNGKey(0)

    def ref_maxpool(x, stride):
        n_, c_, l_ = x.shape
        lo = l_ // stride
        return jnp.max(x[:, :, : lo * stride].reshape(n_, c_, lo, stride), axis=-1)

    k1, k2 = jax.random.split(key)

    # Case 1: f32, L divisible by stride.
    x1 = jax.random.normal(k1, (2, 4, 16), dtype=jnp.float32)
    o1 = jax.block_until_ready(frame_max_pool(x1, 4))
    assert o1.shape == (2, 4, 4) and o1.dtype == x1.dtype
    assert bool(jnp.array_equal(o1, ref_maxpool(x1, 4))), "case 1 mismatch"

    # Case 2: bf16, remainder frames dropped (L % stride != 0).
    x2 = jax.random.normal(k2, (2, 4, 19), dtype=jnp.bfloat16)
    o2 = jax.block_until_ready(frame_max_pool(x2, 3))
    assert o2.shape == (2, 4, 6) and o2.dtype == x2.dtype
    assert bool(jnp.array_equal(o2, ref_maxpool(x2, 3))), "case 2 mismatch"

    print("KERNEL_OK")
</pallas_src>

<mosaic_0001>
module attributes {stable_mosaic.version = 11 : i64} {
  func.func @_maxpool_kernel(%arg0: i32, %arg1: i32, %arg2: i32, %arg3: i32, %arg4: memref<1x1x4x4xf32, #tpu.memory_space<vmem>>, %arg5: memref<1x4x4xf32, #tpu.memory_space<vmem>>) attributes {dimension_semantics = [#tpu.dimension_semantics<parallel>, #tpu.dimension_semantics<parallel>, #tpu.dimension_semantics<parallel>, #tpu.dimension_semantics<arbitrary>], iteration_bounds = array<i64: 2, 1, 1, 4>, scalar_prefetch = 0 : i64, scratch_operands = 0 : i64, tpu.core_type = #tpu.core_type<tc>, window_params = [{transform_indices = @transform_0, window_bounds = array<i64: 1, 1, 4, 4>}, {transform_indices = @transform_1, window_bounds = array<i64: 1, 4, 4>}]} {
    %c0_i32 = arith.constant 0 : i32
    %0 = arith.cmpi eq, %arg3, %c0_i32 : i32
    %1 = arith.extui %0 : i1 to i32
    %c0_i32_0 = arith.constant 0 : i32
    %2 = arith.cmpi ne, %1, %c0_i32_0 : i32
    scf.if %2 {
      %c0 = arith.constant 0 : index
      %c0_3 = arith.constant 0 : index
      %c0_4 = arith.constant 0 : index
      %c0_5 = arith.constant 0 : index
      %6 = vector.load %arg4[%c0, %c0_3, %c0_4, %c0_5] : memref<1x1x4x4xf32, #tpu.memory_space<vmem>>, vector<1x1x4x4xf32>
      %7 = vector.shape_cast %6 : vector<1x1x4x4xf32> to vector<4x4xf32>
      %c0_6 = arith.constant 0 : index
      %c0_7 = arith.constant 0 : index
      %c0_8 = arith.constant 0 : index
      %8 = vector.load %arg5[%c0_6, %c0_7, %c0_8] : memref<1x4x4xf32, #tpu.memory_space<vmem>>, vector<1x4x4xf32>
      %9 = vector.shape_cast %8 : vector<1x4x4xf32> to vector<4x4xf32>
      %10 = vector.shape_cast %7 : vector<4x4xf32> to vector<1x4x4xf32>
      tpu.vector_store %arg5[%c0_6, %c0_7, %c0_8], %10 {strides = array<i32>} : memref<1x4x4xf32, #tpu.memory_space<vmem>>, vector<1x4x4xf32>,
    } else {
    }
    %c0_i32_1 = arith.constant 0 : i32
    %3 = arith.cmpi ne, %arg3, %c0_i32_1 : i32
    %4 = arith.extui %3 : i1 to i32
    %c0_i32_2 = arith.constant 0 : i32
    %5 = arith.cmpi ne, %4, %c0_i32_2 : i32
    scf.if %5 {
      %c0 = arith.constant 0 : index
      %c0_3 = arith.constant 0 : index
      %c0_4 = arith.constant 0 : index
      %6 = vector.load %arg5[%c0, %c0_3, %c0_4] : memref<1x4x4xf32, #tpu.memory_space<vmem>>, vector<1x4x4xf32>
      %7 = vector.shape_cast %6 : vector<1x4x4xf32> to vector<4x4xf32>
      %c0_5 = arith.constant 0 : index
      %c0_6 = arith.constant 0 : index
      %c0_7 = arith.constant 0 : index
      %c0_8 = arith.constant 0 : index
      %8 = vector.load %arg4[%c0_5, %c0_6, %c0_7, %c0_8] : memref<1x1x4x4xf32, #tpu.memory_space<vmem>>, vector<1x1x4x4xf32>
      %9 = vector.shape_cast %8 : vector<1x1x4x4xf32> to vector<4x4xf32>
      %10 = arith.maximumf %7, %9 : vector<4x4xf32>
      %c0_9 = arith.constant 0 : index
      %c0_10 = arith.constant 0 : index
      %c0_11 = arith.constant 0 : index
      %11 = vector.load %arg5[%c0_9, %c0_10, %c0_11] : memref<1x4x4xf32, #tpu.memory_space<vmem>>, vector<1x4x4xf32>
      %12 = vector.shape_cast %11 : vector<1x4x4xf32> to vector<4x4xf32>
      %13 = vector.shape_cast %10 : vector<4x4xf32> to vector<1x4x4xf32>
      tpu.vector_store %arg5[%c0_9, %c0_10, %c0_11], %13 {strides = array<i32>} : memref<1x4x4xf32, #tpu.memory_space<vmem>>, vector<1x4x4xf32>,
    } else {
    }
    return
  }
  func.func @transform_0(%arg0: i32, %arg1: i32, %arg2: i32, %arg3: i32) -> (i32, i32, i32, i32) {
    %c0_i32 = arith.constant 0 : i32
    return %arg0, %arg3, %arg1, %arg2 : i32, i32, i32, i32
  }
  func.func @transform_1(%arg0: i32, %arg1: i32, %arg2: i32, %arg3: i32) -> (i32, i32, i32) {
    %c0_i32 = arith.constant 0 : i32
    return %arg0, %arg1, %arg2 : i32, i32, i32
  }
}

</mosaic_0001>

<bundles_post_ra>
// kernel: tpu_custom_call.1
= control target key start
LH: loop header
LB: loop body
LE: loop exit
PB: predicated region body
PF: predicated region fallthrough
CT: control target
= control target key end

     0   :  { %6 = vsyncpa [#allocation3], 0  ;;  %s795_s0 = inlined_call_operand.hbm [shape: f32[2,4,4,4], index: 0, kind: input, shape index: {}]   ;;  %s796_s1 = inlined_call_operand.hbm [shape: f32[2,4,4], index: 1, kind: output, shape index: {}]  }
   0x1   :  { %8 = vsyncpa [#allocation3 + $0x1], 0 }
   0x2   :  { %9 = vsyncpa [#allocation4], 0 }
   0x3   :  { %11 = vsyncpa [#allocation4 + $0x1], 0  ;;  %s581_s6 = smov 0   ;;  %s583_s7 = smov 0  }
   0x4   :  { %s585_s8 = smov 0   ;;  %s587_s9 = smov 0  }
   0x5   :  { %s589_s10 = smov 0   ;;  %s591_s11 = smov 0  }
   0x6   :  { %s593_s12 = smov 0   ;;  %s595_s13 = smov 0  }
   0x7   :  { %s597_s14 = smov 0   ;;  %s599_s15 = smov 0  }
   0x8   :  { %s601_s16 = smov 0  }
   0x9 LB: > { %s297_s17 = sadd.s32 4294967295, %s567_s16   ;;  %s298_s18 = sadd.s32 4294967294, %s567_s16   ;;  %s567_s16 = sphi %s601_s16, %s17_s16   ;;  %s563_s15 = sphi %s599_s15, %s816_s15   ;;  %s559_s14 = sphi %s597_s14, %s815_s14   ;;  %s555_s13 = sphi %s595_s13, %s814_s13   ;;  %s551_s12 = sphi %s593_s12, %s813_s12   ;;  %s547_s11 = sphi %s591_s11, %s812_s11   ;;  %s543_s10 = sphi %s589_s10, %s811_s10   ;;  %s539_s9 = sphi %s587_s9, %s810_s9   ;;  %s535_s8 = sphi %s585_s8, %s809_s8   ;;  %s531_s7 = sphi %s583_s7, %s808_s7   ;;  %s527_s6 = sphi %s581_s6, %s807_s6  }
   0xa   : > { %s32_s19 = sadd.s32 1, %s559_s14  ;;  %s43_s20 = sadd.s32 1, %s563_s15 }
   0xb   : > { %p33_p0 = scmp.ge.s32.totalorder %s32_s19, 4  ;;  %s56_s21 = sadd.s32 1, %s547_s11 }
   0xc   : > { %p63_p1 = scmp.ne.s32.totalorder %s547_s11, %s543_s10  ;;  %p64_p2 = scmp.eq.s32.totalorder %s567_s16, 0 }
   0xd   : > { %s818_s19 = smov (%p33_p0, %s32_s19), 0  ;;  %s820_s20 = smov (!%p33_p0, %s43_s20), %s563_s15 }
   0xe   : > { %s48_s22 = ssub.s32 %s559_s14, %s818_s19  ;;  %p647_p3 = por %p64_p2, %p63_p1 }
   0xf   : > { %p45_p4 = scmp.ge.s32.totalorder %s820_s20, 2  ;;  %p69_p5 = scmp.ne.s32.totalorder %s543_s10, %s539_s9 }
  0x10   : > { %p70_p6 = scmp.eq.s32.totalorder %s297_s17, 0  ;;  %s86_s24 = sadd.s32 1, %s535_s8 }
  0x11   : > { %s822_s20 = smov (%p45_p4, %s820_s20), 0  ;;  %p96_p8 = scmp.ne.s32.totalorder %s535_s8, %s531_s7 }
  0x12   : > { %p655_p7 = por %p70_p6, %p69_p5  ;;  %s47_s26 = ssub.s32 %s563_s15, %s822_s20 }
  0x13   : > { %p97_p9 = scmp.eq.s32.totalorder %s297_s17, 7  ;;  %s49_s27 = sor.u32 %s48_s22, %s47_s26 }
  0x14   : > { %p84_p10 = scmp.eq.s32.totalorder %s47_s26, 0  ;;  %p54_p11 = scmp.eq.s32.totalorder %s49_s27, 0 }
  0x15   : > { %p663_p12 = por %p97_p9, %p96_p8  ;;  %p102_p13 = scmp.ne.s32.totalorder %s531_s7, %s527_s6 }
  0x16   : > { %s668_s29 = scalar_select %p84_p10, %s535_s8, %s86_s24  }
  0x17   : > { %s800_s28 = scalar_select %p663_p12, 1, 0 }
  0x18   : > { %s671_s30 = scalar_select %p54_p11, %s547_s11, %s56_s21  }
  0x19   : > { %p103_p0 = scmp.eq.s32.totalorder %s298_s18, 7  ;;  %p325_p1 = scmp.lt.s32.totalorder %s567_s16, 8 }
  0x1a   : > { %s123_s3 = sand.u32 1, %s547_s11   ;;  %s302_s5 = sshll.u32 %s563_s15, 2 }
  0x1b   : > { %p676_p2 = por %p103_p0, %p102_p13  ;;  %s301_s4 = sshll.u32 %s123_s3, 2 }
  0x1c   : > { %s134_s9 = sadd.s32 %s559_s14, %s302_s5  ;;  %s127_s17 = scalar_lea.vmem [#allocation2], %s301_s4 }
  0x1d   : > { %s801_s2 = scalar_select %p676_p2, 1, 0 }
  0x1e   : > { %s138_s22 = sshll.u32 %s127_s17, 4  ;;  %s303_s26 = sshll.u32 %s134_s9, 6  ;;  %s683_s22 = int_to_ptr.vmem [resolvable:$true] %s138_s22 }
  0x1f   : > { %s688_s27 = scalar_lea.hbm %s795_s0, %s303_s26  ;;  %p692_p4 = pnand %p325_p1, %p647_p3 }
  0x20   : > { %s124_s4 = scalar_lea.sflag [#allocation3], %s123_s3  ;;  %s415_s5 = scalar_lea.hbm %s688_s27, 64 }
  0x21   : > { %p416_p8 = scmp.ne.s32.totalorder %s688_s27, %s415_s5  ;;  %p417_p9 = pneg %p692_p4 }
  0x22   : > { %s420_s17 = scalar_lea.hbm %s795_s0, 512  ;;  %p421_p3 = scmp.lt.u32.totalorder %s688_s27, %s795_s0 }
  0x23   : > { %p418_p10 = pnand %p417_p9, %p416_p8  ;;  %p422_p13 = scmp.lt.u32.totalorder %s420_s17, %s415_s5 }
  0x24   : > { %p424_p1 = scmp.lt.u32.totalorder %s415_s5, %s688_s27 }
  0x25   : > { %p419_p11 = pneg %p418_p10  ;;  %p423_p0 = por %p422_p13, %p421_p3 }
  0x27   : > { %p425_p5 = por %p424_p1, %p423_p0 }
  0x29   : > { %p426_p6 = pnand %p425_p5, %p419_p11 }
  0x2b   : > { %429 = shalt.err (!%p426_p6)
}
  0x2c   : > { %s430_s3 = scalar_lea.vmem %s683_s22, 64  ;;  %s569_s21 = smov [#allocation2]  }
  0x2d   : > { %p431_p8 = scmp.ne.s32.totalorder %s683_s22, %s430_s3  ;;  %s435_s23 = sshll.u32 %s569_s21, 4  ;;  %s436_s23 = int_to_ptr.vmem [resolvable:$false] %s435_s23 }
  0x2e   : > { %s437_s9 = scalar_lea.vmem %s436_s23, 128  ;;  %p438_p12 = scmp.lt.s32.totalorder %s683_s22, %s436_s23 }
  0x2f   : > { %p433_p10 = pnand %p431_p8, %p417_p9  ;;  %p439_p3 = scmp.lt.s32.totalorder %s437_s9, %s430_s3 }
  0x31   : > { %p434_p2 = pneg %p433_p10  ;;  %p440_p13 = por %p439_p3, %p438_p12 }
  0x33   : > { %p441_p0 = pnand %p440_p13, %p434_p2 }
  0x35   : > { %444 = shalt.err (!%p441_p0)
}
  0x36   : > { %320 = dma.hbm_to_vmem [thread:$0]  (!%p692_p4), %s688_s27, 64, %s683_s22, %s124_s4  }
  0x37   : > { %p803_p5 = scmp.lt.s32.totalorder %s567_s16, 9  ;;  %p804_p6 = scmp.ge.s32.totalorder %s567_s16, 1 }
  0x39   : > { %p144_p9 = pnand %p804_p6, %p803_p5 }
  0x3a   : > { %s149_s5 = sand.u32 (!%p144_p9), 1, %s543_s10  }
  0x3b   : > { %147 = sbr.rel (%p144_p9) target bundleno = 110 (0x6e), region = 24  ;;  %s305_s17 = sshll.u32 (!%p144_p9), %s149_s5, 2 }
  0x3c   : > { %s150_s26 = scalar_lea.sflag (!%p144_p9), [#allocation3], %s149_s5  ;;  %s153_s24 = scalar_lea.vmem (!%p144_p9), [#allocation2], %s305_s17 }
  0x42   : > { %518 = dma.done.wait (%p655_p7), %s150_s26, 64  }
  0x43   : > { %520 = vsyncadd (%p655_p7), %s150_s26, 4294967232  ;;  %s169_s18 = sand.u32 1, %s531_s7   ;;  %p307_p12 = scmp.ne.s32.totalorder %s551_s12, 0 }
  0x44   : > { %s306_s3 = sshll.u32 %s169_s18, 2  ;;  %v176_v0 = vld [vmem:[%s153_s24] sm:$0xf] (!%p307_p12)  ;;  %vm177_vm0 = vcmask (!%p307_p12), 27648  }
  0x45   : > { %s171_s21 = scalar_lea.vmem [#allocation5], %s306_s3  ;;  %175 = sbr.rel (%p307_p12) target bundleno = 76 (0x4c), region = 32 }
  0x46   : > { %178 = vst.msk [vmem:[%s171_s21] sm:$0xf] (!%p307_p12), %vm177_vm0, %v176_v0 }
  0x4c PF: > { %p308_p2 = scmp.eq.s32.totalorder %s551_s12, 0 }
  0x4d   : > { %v183_v1 = vld [vmem:[%s171_s21] sm:$0xf] (!%p308_p2)  ;;  %v184_v2 = vld [vmem:[%s153_s24] sm:$0xf] (!%p308_p2)  ;;  %vm186_vm1 = vcmask (!%p308_p2), 27648  }
  0x4e   : > { %182 = sbr.rel (%p308_p2) target bundleno = 85 (0x55), region = 36  ;;  %v185_v3 = vmax.f32 (!%p308_p2), %v183_v1, %v184_v2 }
  0x50   : > { %187 = vst.msk [vmem:[%s171_s21] sm:$0xf] (!%p308_p2), %vm186_vm1, %v185_v3 }
  0x55 PF: > { %s310_s25 = sshll.u32 %s555_s13, 6  ;;  %s204_s23 = sshll.u32 %s171_s21, 4  ;;  %s205_s23 = int_to_ptr.vmem [resolvable:$true] %s204_s23 }
  0x56   : > { %s739_s4 = scalar_lea.hbm %s796_s1, %s310_s25  ;;  %s189_s9 = scalar_lea.sflag [#allocation4], %s169_s18 }
  0x57   : > { %s445_s5 = scalar_lea.vmem %s205_s23, 64  ;;  %p805_p4 = scmp.ne.s32.totalorder %s800_s28, 0 }
  0x58   : > { %p446_p7 = scmp.ne.s32.totalorder %s205_s23, %s445_s5  ;;  %s570_s12 = smov [#allocation5]  }
  0x59   : > { %s449_s17 = sshll.u32 %s570_s12, 4  ;;  %s450_s17 = int_to_ptr.vmem [resolvable:$false] %s449_s17 }
  0x5a   : > { %p447_p11 = pnand %p446_p7, %p805_p4  ;;  %s451_s26 = scalar_lea.vmem %s450_s17, 128 }
  0x5b   : > { %p452_p8 = scmp.lt.s32.totalorder %s205_s23, %s450_s17  ;;  %p453_p10 = scmp.lt.s32.totalorder %s451_s26, %s445_s5 }
  0x5c   : > { %p448_p1 = pneg %p447_p11 }
  0x5d   : > { %p454_p3 = por %p453_p10, %p452_p8 }
  0x5f   : > { %p455_p13 = pnand %p454_p3, %p448_p1 }
  0x61   : > { %458 = shalt.err (!%p455_p13)
}
  0x62   : > { %s459_s13 = scalar_lea.hbm %s739_s4, 64  ;;  %s463_s3 = scalar_lea.hbm %s796_s1, 128 }
  0x63   : > { %p460_p0 = scmp.ne.s32.totalorder %s739_s4, %s459_s13  ;;  %p464_p9 = scmp.lt.u32.totalorder %s739_s4, %s796_s1 }
  0x64   : > { %p465_p12 = scmp.lt.u32.totalorder %s463_s3, %s459_s13  ;;  %p467_p7 = scmp.lt.u32.totalorder %s459_s13, %s739_s4 }
  0x65   : > { %p461_p5 = pnand %p460_p0, %p805_p4 }
  0x66   : > { %p466_p2 = por %p465_p12, %p464_p9 }
  0x67   : > { %p462_p6 = pneg %p461_p5 }
  0x68   : > { %p468_p11 = por %p467_p7, %p466_p2 }
  0x6a   : > { %p469_p1 = pnand %p468_p11, %p462_p6 }
  0x6c   : > { %472 = shalt.err (!%p469_p1)
}
  0x6d   : > { %315 = dma.vmem_to_hbm [thread:$0]  (%p805_p4), %s205_s23, 64, %s739_s4, %s189_s9  }
  0x6e PF: > { %p326_p8 = scmp.ge.s32.totalorder %s567_s16, 2  ;;  %s216_s22 = sand.u32 1, %s527_s6  }
  0x6f   : > { %p806_p10 = scmp.ne.s32.totalorder %s801_s2, 0  ;;  %s217_s27 = scalar_lea.sflag [#allocation4], %s216_s22 }
  0x71   : > { %p322_p3 = pnand %p326_p8, %p806_p10 }
  0x73   : > { %522 = dma.done.wait (!%p322_p3), %s217_s27, 64  }
  0x74   : > { %524 = vsyncadd (!%p322_p3), %s217_s27, 4294967232  ;;  %s17_s16 = sadd.s32 1, %s567_s16   ;;  %s807_s6 = smov %s531_s7 }
  0x75   : > { %p14_p13 = scmp.ge.s32.totalorder %s17_s16, 10   ;;  %s808_s7 = smov %s535_s8 }
  0x76   : > { %s809_s8 = smov %s668_s29  ;;  %s810_s9 = smov %s543_s10 }
  0x77   : > { %s811_s10 = smov %s547_s11  ;;  %s812_s11 = smov %s671_s30 }
  0x78   : > { %s813_s12 = smov %s559_s14  ;;  %s814_s13 = smov %s563_s15 }
  0x79   : > { %s815_s14 = smov %s818_s19  ;;  %s816_s15 = smov %s822_s20 }
  0x7a   :  { %16 = sbr.rel (!%p14_p13) target bundleno = 9 (0x9), region = 77 }
  0x81   :  { %222 = vsyncpa [#allocation3], 1 }
  0x82   :  { %224 = vsyncpa [#allocation3 + $0x1], 1 }
  0x83   :  { %225 = vsyncpa [#allocation4], 1 }
  0x84   :  { %227 = vsyncpa [#allocation4 + $0x1], 1 }

</bundles_post_ra>
